<compile_context>
chip_gen: v5e
topology: v5e:2x2
jax: 0.10.0
libtpu: 0.0.40
codegen_flags: <defaults>
</compile_context>

<pallas_src>
import numpy as np
import jax
import jax.numpy as jnp
from jax.experimental import pallas as pl
from jax.experimental.pallas import tpu as pltpu


def tms_spd_kernel(x_ref, mk_ref, a1_ref, w12_ref, b2_ref, bf_ref, out_ref):
    """One batch tile, all instances fused via block-diagonal weights.

    x_ref  : (TB, n_inst*d_in)            io   activations (native layout, trailing dims merged)
    mk_ref : (TB, n_inst*m*C)             io   topk mask pre-expanded to the fused component axis
    a1_ref : (n_inst*d_in, n_inst*m*C)    wdt  block-diag linear1 A
    w12_ref: (n_inst*m*C, n_inst*m*C)     wdt  block-diag fused  B1 @ A2  (no nonlinearity between)
    b2_ref : (n_inst*m*C, n_inst*d_in)    wdt  block-diag linear2 B (tied = A^T)
    bf_ref : (1, n_inst*d_in)             f32  b_final
    out_ref: (TB, n_inst*d_in)            io
    """
    f32 = jnp.float32
    wdt = a1_ref.dtype
    x = x_ref[...].astype(wdt)
    mask = mk_ref[...].astype(f32)                    # elementwise path stays f32 (v5e VPU)

    z1 = jnp.dot(x, a1_ref[...], preferred_element_type=f32)      # (TB, n_inst*Cm)
    z1 = (z1 * mask).astype(wdt)
    z2 = jnp.dot(z1, w12_ref[...], preferred_element_type=f32)    # (TB, n_inst*Cm)
    z2 = (z2 * mask).astype(wdt)
    out = jnp.dot(z2, b2_ref[...], preferred_element_type=f32)    # (TB, n_inst*d_in)

    out = jnp.maximum(out + bf_ref[...], 0.0)         # bias + ReLU in f32
    out_ref[...] = out.astype(out_ref.dtype)          # single lane-dense full-block store


def _block_diag(blocks):
    """(n, r, c) -> (n*r, n*c) block-diagonal matrix."""
    n, r, c = blocks.shape
    out = jnp.zeros((n * r, n * c), blocks.dtype)
    for i in range(n):
        out = out.at[i * r:(i + 1) * r, i * c:(i + 1) * c].set(blocks[i])
    return out


def prepare_tms_spd_params(A, B, b_final, compute_dtype=jnp.bfloat16):
    """Run-once weight prep (constant-folds under jit).

    A: (n_inst, C, d_in, m); B: (n_inst, C, m, d_out); b_final: (n_inst, d_in).
    Fuses the (C, m) component axes into m*C (m-major, index j = k*C + c), fuses the two
    middle matmuls into W12 = B1 @ A2 in f32, builds block-diagonal weights over instances,
    and casts once to the compute dtype.
    """
    n_inst, C, d_in, m = A.shape
    d_out = B.shape[-1]
    Cm = m * C
    A32 = A.astype(jnp.float32)
    B32 = B.astype(jnp.float32)
    # fused component index j = k*C + c  (k = rank index, c = component index)
    A1r = jnp.transpose(A32, (0, 2, 3, 1)).reshape(n_inst, d_in, Cm)    # (i, d_in, m*C)
    B1r = jnp.transpose(B32, (0, 2, 1, 3)).reshape(n_inst, Cm, d_out)   # (i, m*C, d_out)
    A2r = jnp.transpose(B32, (0, 3, 2, 1)).reshape(n_inst, d_out, Cm)   # (i, d_out, m*C)
    B2r = jnp.transpose(A32, (0, 3, 1, 2)).reshape(n_inst, Cm, d_in)    # (i, m*C, d_in)
    W12 = jnp.einsum('ikn,inl->ikl', B1r, A2r)                          # f32 middle-matmul fusion

    return dict(
        A1_bd=_block_diag(A1r).astype(compute_dtype),
        W12_bd=_block_diag(W12).astype(compute_dtype),
        B2_bd=_block_diag(B2r).astype(compute_dtype),
        b_final=b_final.reshape(1, n_inst * d_in).astype(jnp.float32),
    )


def _pick_batch_tile(batch, nF, nK, io_bytes, vmem_budget_bytes=16 * 1024 * 1024):
    """Batch-tile rows.  The kernel is overhead/HBM-bound, never VMEM-bound at these feature
    widths, so make the tile as large as a conservative budget allows (cap 2048 rows), and for
    batch >= 16 clamp it so the grid has >= 2 steps (lets the 'parallel' axis shard across both
    v7x TensorCores; no-op on single-TC v5e/v6e)."""
    per_row = (2 * io_bytes * (2 * nF + nK)       # x / mask / out blocks, double-buffered
               + 4 * (2 * nK + 2 * nF))           # in-kernel f32 intermediates (z1, z2, out, x)
    tb = vmem_budget_bytes // max(per_row, 1)
    tb = max(8, min(2048, (tb // 8) * 8))
    if batch <= tb:
        tb = batch                                # full-extent block (always legal)
    if batch >= 16:
        half = (((batch + 1) // 2) + 7) // 8 * 8  # force >= 2 grid steps for megacore
        tb = min(tb, half)
    return tb


def tms_spd_forward(x, topk_mask, params):
    """x: (batch, n_instances, n_features); topk_mask: (batch, n_instances, C);
    params: output of prepare_tms_spd_params.  Returns (batch, n_instances, n_features) f32."""
    A1_bd, W12_bd, B2_bd, bf = (params["A1_bd"], params["W12_bd"],
                                params["B2_bd"], params["b_final"])
    io_dtype = A1_bd.dtype
    io_bytes = A1_bd.dtype.itemsize
    batch, n_inst, d_in = x.shape
    C = topk_mask.shape[-1]
    nF = n_inst * d_in                 # flattened feature width
    nK = A1_bd.shape[1]                # n_inst * m * C  (fused component width)
    m = (nK // n_inst) // C

    # Free reshapes / cheap broadcast only -- no host-side transposes of activations.
    x2 = x.reshape(batch, nF).astype(io_dtype)
    mk2 = jnp.broadcast_to(topk_mask[:, :, None, :].astype(io_dtype),
                           (batch, n_inst, m, C)).reshape(batch, nK)

    TB = _pick_batch_tile(batch, nF, nK, io_bytes)
    nbt = pl.cdiv(batch, TB)

    flops = 2 * batch * (nF * nK + nK * nK + nK * nF)
    bytes_accessed = ((x2.size + mk2.size + batch * nF) * io_bytes
                      + (A1_bd.size + W12_bd.size + B2_bd.size) * io_bytes
                      + bf.size * 4)

    out = pl.pallas_call(
        tms_spd_kernel,
        out_shape=jax.ShapeDtypeStruct((batch, nF), io_dtype),
        grid=(nbt,),
        in_specs=[
            pl.BlockSpec((TB, nF), lambda b: (b, 0)),
            pl.BlockSpec((TB, nK), lambda b: (b, 0)),
            # weights & bias: constant block index -> DMA'd once, VMEM-resident across tiles
            pl.BlockSpec((nF, nK), lambda b: (0, 0)),
            pl.BlockSpec((nK, nK), lambda b: (0, 0)),
            pl.BlockSpec((nK, nF), lambda b: (0, 0)),
            pl.BlockSpec((1, nF), lambda b: (0, 0)),
        ],
        out_specs=pl.BlockSpec((TB, nF), lambda b: (b, 0)),
        compiler_params=pltpu.CompilerParams(dimension_semantics=("parallel",)),
        cost_estimate=pl.CostEstimate(flops=int(flops), transcendentals=0,
                                      bytes_accessed=int(bytes_accessed)),
    )(x2, mk2, A1_bd, W12_bd, B2_bd, bf)

    return out.reshape(batch, n_inst, d_in).astype(jnp.float32)


def reference_forward(x, topk_mask, A, B, b_final):
    """Pure-JAX f32 transcription of TMSSPDModel.forward (einops einsums)."""
    inner = jnp.einsum('bid,icdm->bicm', x, A)
    inner = inner * topk_mask[..., None]
    comp = jnp.einsum('bicm,icmn->bicn', inner, B)
    h = comp.sum(axis=2)
    A2 = jnp.transpose(B, (0, 1, 3, 2))   # (i, C, d_out, m)
    B2 = jnp.transpose(A, (0, 1, 3, 2))   # (i, C, m, d_in)
    inner2 = jnp.einsum('bin,icnm->bicm', h, A2)
    inner2 = inner2 * topk_mask[..., None]
    comp2 = jnp.einsum('bicm,icmd->bicd', inner2, B2)
    out = comp2.sum(axis=2) + b_final[None]
    return jax.nn.relu(out)


if __name__ == "__main__":
    key = jax.random.PRNGKey(0)
    n_instances, n_features, n_hidden, C = 2, 16, 8, 4
    m = min(n_features, n_hidden) + 1          # default m in LinearComponent -> 9
    batch = 8
    bias_val = 0.0

    k_a, k_b, k_x, k_m = jax.random.split(key, 4)
    A = jax.random.normal(k_a, (n_instances, C, n_features, m), jnp.float32) * 0.02
    B = jax.random.normal(k_b, (n_instances, C, m, n_hidden), jnp.float32) * 0.02
    b_final = jnp.zeros((n_instances, n_features), jnp.float32) + bias_val

    x = jax.random.normal(k_x, (batch, n_instances, n_features), jnp.float32)
    topk_mask = (jax.random.uniform(k_m, (batch, n_instances, C)) > 0.5).astype(jnp.float32)

    ref = reference_forward(x, topk_mask, A, B, b_final)
    fwd = jax.jit(tms_spd_forward)

    # f32 compute path: tight check against the pure-JAX reference.
    params_f32 = prepare_tms_spd_params(A, B, b_final, compute_dtype=jnp.float32)
    out_f32 = fwd(x, topk_mask, params_f32)
    jax.block_until_ready(out_f32)
    np.testing.assert_allclose(np.asarray(out_f32), np.asarray(ref), rtol=1e-5, atol=1e-6)

    # bf16 fast path: bf16 activation I/O + matmul inputs, f32 accumulation -> looser tolerance.
    params_bf16 = prepare_tms_spd_params(A, B, b_final, compute_dtype=jnp.bfloat16)
    out_bf16 = fwd(x, topk_mask, params_bf16)
    jax.block_until_ready(out_bf16)
    np.testing.assert_allclose(np.asarray(out_bf16), np.asarray(ref), rtol=5e-2, atol=1e-5)

    print("KERNEL_OK")
</pallas_src>

<mosaic_0001>
module attributes {stable_mosaic.version = 11 : i64} {
  func.func @tms_spd_kernel(%arg0: i32, %arg1: memref<8x32xf32, #tpu.memory_space<vmem>>, %arg2: memref<8x72xf32, #tpu.memory_space<vmem>>, %arg3: memref<32x72xf32, #tpu.memory_space<vmem>>, %arg4: memref<72x72xf32, #tpu.memory_space<vmem>>, %arg5: memref<72x32xf32, #tpu.memory_space<vmem>>, %arg6: memref<1x32xf32, #tpu.memory_space<vmem>>, %arg7: memref<8x32xf32, #tpu.memory_space<vmem>>) attributes {dimension_semantics = [#tpu.dimension_semantics<parallel>], iteration_bounds = array<i64: 1>, scalar_prefetch = 0 : i64, scratch_operands = 0 : i64, tpu.core_type = #tpu.core_type<tc>, window_params = [{transform_indices = @transform_0, window_bounds = array<i64: 8, 32>}, {transform_indices = @transform_1, window_bounds = array<i64: 8, 72>}, {pipeline_mode = #tpu.pipeline_mode<synchronous>, transform_indices = @transform_2, window_bounds = array<i64: 32, 72>}, {pipeline_mode = #tpu.pipeline_mode<synchronous>, transform_indices = @transform_3, window_bounds = array<i64: 72, 72>}, {pipeline_mode = #tpu.pipeline_mode<synchronous>, transform_indices = @transform_4, window_bounds = array<i64: 72, 32>}, {pipeline_mode = #tpu.pipeline_mode<synchronous>, transform_indices = @transform_5, window_bounds = array<i64: 1, 32>}, {transform_indices = @transform_6, window_bounds = array<i64: 8, 32>}]} {
    %c0 = arith.constant 0 : index
    %c0_0 = arith.constant 0 : index
    %0 = vector.load %arg1[%c0, %c0_0] : memref<8x32xf32, #tpu.memory_space<vmem>>, vector<8x32xf32>
    %c0_1 = arith.constant 0 : index
    %c0_2 = arith.constant 0 : index
    %1 = vector.load %arg2[%c0_1, %c0_2] : memref<8x72xf32, #tpu.memory_space<vmem>>, vector<8x72xf32>
    %c0_3 = arith.constant 0 : index
    %c0_4 = arith.constant 0 : index
    %2 = vector.load %arg3[%c0_3, %c0_4] : memref<32x72xf32, #tpu.memory_space<vmem>>, vector<32x72xf32>
    %cst = arith.constant dense<0.000000e+00> : vector<8x72xf32>
    %3 = tpu.matmul %0, %2, %cst {dimension_numbers = #tpu.dot_dimension_numbers<[1], [0], [0], [1], [0, 0, 1, 1], [], []>} : vector<8x32xf32>, vector<32x72xf32>, vector<8x72xf32> -> vector<8x72xf32>
    %4 = arith.mulf %3, %1 : vector<8x72xf32>
    %c0_5 = arith.constant 0 : index
    %c0_6 = arith.constant 0 : index
    %5 = vector.load %arg4[%c0_5, %c0_6] : memref<72x72xf32, #tpu.memory_space<vmem>>, vector<72x72xf32>
    %cst_7 = arith.constant dense<0.000000e+00> : vector<8x72xf32>
    %6 = tpu.matmul %4, %5, %cst_7 {dimension_numbers = #tpu.dot_dimension_numbers<[1], [0], [0], [1], [0, 0, 1, 1], [], []>} : vector<8x72xf32>, vector<72x72xf32>, vector<8x72xf32> -> vector<8x72xf32>
    %7 = arith.mulf %6, %1 : vector<8x72xf32>
    %c0_8 = arith.constant 0 : index
    %c0_9 = arith.constant 0 : index
    %8 = vector.load %arg5[%c0_8, %c0_9] : memref<72x32xf32, #tpu.memory_space<vmem>>, vector<72x32xf32>
    %cst_10 = arith.constant dense<0.000000e+00> : vector<8x32xf32>
    %9 = tpu.matmul %7, %8, %cst_10 {dimension_numbers = #tpu.dot_dimension_numbers<[1], [0], [0], [1], [0, 0, 1, 1], [], []>} : vector<8x72xf32>, vector<72x32xf32>, vector<8x32xf32> -> vector<8x32xf32>
    %c0_11 = arith.constant 0 : index
    %c0_12 = arith.constant 0 : index
    %10 = vector.load %arg6[%c0_11, %c0_12] : memref<1x32xf32, #tpu.memory_space<vmem>>, vector<1x32xf32>
    %11 = vector.broadcast %10 : vector<1x32xf32> to vector<8x32xf32>
    %12 = arith.addf %9, %11 : vector<8x32xf32>
    %cst_13 = arith.constant 0.000000e+00 : f32
    %13 = vector.broadcast %cst_13 : f32 to vector<8x32xf32>
    %14 = arith.maximumf %12, %13 : vector<8x32xf32>
    %c0_14 = arith.constant 0 : index
    %c0_15 = arith.constant 0 : index
    %15 = vector.load %arg7[%c0_14, %c0_15] : memref<8x32xf32, #tpu.memory_space<vmem>>, vector<8x32xf32>
    tpu.vector_store %arg7[%c0_14, %c0_15], %14 {strides = array<i32>} : memref<8x32xf32, #tpu.memory_space<vmem>>, vector<8x32xf32>,
    return
  }
  func.func @transform_0(%arg0: i32) -> (i32, i32) {
    %c0_i32 = arith.constant 0 : i32
    %c0_i32_0 = arith.constant 0 : i32
    return %arg0, %c0_i32 : i32, i32
  }
  func.func @transform_1(%arg0: i32) -> (i32, i32) {
    %c0_i32 = arith.constant 0 : i32
    %c0_i32_0 = arith.constant 0 : i32
    return %arg0, %c0_i32 : i32, i32
  }
  func.func @transform_2(%arg0: i32) -> (i32, i32) {
    %c0_i32 = arith.constant 0 : i32
    %c0_i32_0 = arith.constant 0 : i32
    %c0_i32_1 = arith.constant 0 : i32
    return %c0_i32, %c0_i32_0 : i32, i32
  }
  func.func @transform_3(%arg0: i32) -> (i32, i32) {
    %c0_i32 = arith.constant 0 : i32
    %c0_i32_0 = arith.constant 0 : i32
    %c0_i32_1 = arith.constant 0 : i32
    return %c0_i32, %c0_i32_0 : i32, i32
  }
  func.func @transform_4(%arg0: i32) -> (i32, i32) {
    %c0_i32 = arith.constant 0 : i32
    %c0_i32_0 = arith.constant 0 : i32
    %c0_i32_1 = arith.constant 0 : i32
    return %c0_i32, %c0_i32_0 : i32, i32
  }
  func.func @transform_5(%arg0: i32) -> (i32, i32) {
    %c0_i32 = arith.constant 0 : i32
    %c0_i32_0 = arith.constant 0 : i32
    %c0_i32_1 = arith.constant 0 : i32
    return %c0_i32, %c0_i32_0 : i32, i32
  }
  func.func @transform_6(%arg0: i32) -> (i32, i32) {
    %c0_i32 = arith.constant 0 : i32
    %c0_i32_0 = arith.constant 0 : i32
    return %arg0, %c0_i32 : i32, i32
  }
}

</mosaic_0001>

<bundles_post_ra>
// kernel: tms_spd_forward.1
= control target key start
LH: loop header
LB: loop body
LE: loop exit
PB: predicated region body
PF: predicated region fallthrough
CT: control target
= control target key end

     0   :  { %vm29_vm0 = vcmask 261120   ;;  %vm63_vm1 = vcmask 588800   ;;  %s249_s2 = inlined_call_operand.vmem [shape: f32[32,72], index: 2, kind: input, shape index: {}]   ;;  %s250_s3 = inlined_call_operand.vmem [shape: f32[72,72], index: 3, kind: input, shape index: {}]   ;;  %s251_s0 = inlined_call_operand.vmem [shape: f32[8,32], index: 0, kind: input, shape index: {}]   ;;  %s252_s4 = inlined_call_operand.vmem [shape: f32[72,32], index: 4, kind: input, shape index: {}]   ;;  %s253_s1 = inlined_call_operand.vmem [shape: f32[8,72], index: 1, kind: input, shape index: {}]   ;;  %s254_s5 = inlined_call_operand.vmem [shape: f32[1,32], index: 5, kind: input, shape index: {}]   ;;  %s255_s6 = inlined_call_operand.vmem [shape: f32[8,32], index: 6, kind: output, shape index: {}]  }
   0x1   :  { %v28_v0 = vld [vmem:[%s249_s2 + $0x18] sm:$0xff]  ;;  %v27_v1 = vld [vmem:[%s249_s2 + $0x10] sm:$0xff]  ;;  %v62_v2 = vld [vmem:[%s250_s3 + $0x40] sm:$0xff] }
   0x2   :  { %45 = vmatpush.msra.mxu0 %v28_v0  ;;  %v26_v3 = vld [vmem:[%s249_s2 + $0x8] sm:$0xff]  ;;  %74 = vmatpush.msra.mxu1 %v62_v2  ;;  %v61_v4 = vld [vmem:[%s250_s3 + $0x38] sm:$0xff]  ;;  %v60_v5 = vld [vmem:[%s250_s3 + $0x30] sm:$0xff] }
   0x3   :  { %v25_v6 = vld [vmem:[%s249_s2] sm:$0xff]  ;;  %v59_v8 = vld [vmem:[%s250_s3 + $0x28] sm:$0xff]  ;;  %v57_v10 = vld [vmem:[%s250_s3 + $0x18] sm:$0xff] }
   0x4   :  { %46 = vmatpush.msra.mxu0 %v27_v1  ;;  %75 = vmatpush.msra.mxu1 %v61_v4  ;;  %v23_v7 = vld [vmem:[%s251_s0] sm:$0xff]  ;;  %v56_v11 = vld [vmem:[%s250_s3 + $0x10] sm:$0xff]  ;;  %v55_v12 = vld [vmem:[%s250_s3 + $0x8] sm:$0xff] }
   0x5   :  { %v58_v9 = vld [vmem:[%s250_s3 + $0x20] sm:$0xff]  ;;  %v95_v15 = vld [vmem:[%s252_s4 + $0x38] sm:$0xff]  ;;  %v94_v16 = vld [vmem:[%s252_s4 + $0x30] sm:$0xff] }
   0x6   :  { %47 = vmatpush.msra.mxu0 %v26_v3  ;;  %76 = vmatpush.msra.mxu1 %v60_v5  ;;  %v54_v13 = vld [vmem:[%s250_s3] sm:$0xff]  ;;  %v93_v17 = vld [vmem:[%s252_s4 + $0x28] sm:$0xff]  ;;  %v91_v19 = vld [vmem:[%s252_s4 + $0x18] sm:$0xff] }
   0x7   :  { %v96_v14 = vld [vmem:[%s252_s4 + $0x40] sm:$0xff]  ;;  %v90_v20 = vld [vmem:[%s252_s4 + $0x10] sm:$0xff]  ;;  %v89_v24 = vld [vmem:[%s252_s4 + $0x8] sm:$0xff] }
   0x8   :  { %48 = vmatpush.msra.mxu0 %v25_v6  ;;  %77 = vmatpush.msra.mxu1 %v59_v8  ;;  %v92_v18 = vld [vmem:[%s252_s4 + $0x20] sm:$0xff] }
   0x9   :  { %130 = vmatmul.msk.f32.vlgmr.msra.gmra.mxu0 %vm29_vm0, %v23_v7  ;;  %111 = vmatpush.msra.mxu2 %v96_v14  ;;  %v24_v21 = vld [vmem:[%s253_s1] sm:$0xff] }
   0xa   :  { %78 = vmatpush.msra.mxu1 %v58_v9  ;;  %v88_v25 = vld [vmem:[%s252_s4] sm:$0xff] }
   0xb   :  { %112 = vmatpush.msra.mxu2 %v95_v15  ;;  %v133_v28 = vld [vmem:[%s254_s5] ss:$0 sm:$0xff] }
   0xc   :  { %79 = vmatpush.msra.mxu1 %v57_v10 }
   0xd   :  { %113 = vmatpush.msra.mxu2 %v94_v16 }
   0xe   :  { %80 = vmatpush.msra.mxu1 %v56_v11 }
   0xf   :  { %114 = vmatpush.msra.mxu2 %v93_v17 }
  0x10   :  { %81 = vmatpush.msra.mxu1 %v55_v12 }
  0x11   :  { %115 = vmatpush.msra.mxu2 %v92_v18 }
  0x12   :  { %82 = vmatpush.msra.mxu1 %v54_v13 }
  0x13   :  { %116 = vmatpush.msra.mxu2 %v91_v19 }
  0x15   :  { %117 = vmatpush.msra.mxu2 %v90_v20 }
  0x17   :  { %118 = vmatpush.msra.mxu2 %v89_v24 }
  0x19   :  { %119 = vmatpush.msra.mxu2 %v88_v25 }
  0x86   :  { %v50_v22 = vpop.f32.mrf.mxu0 }
  0x87   :  { %v53_v23 = vmul.f32 %v50_v22, %v24_v21 }
  0x89   :  { %131 = vmatmul.msk.f32.vlgmr.msra.gmra.mxu1 %vm63_vm1, %v53_v23 }
 0x106   :  { %v84_v26 = vpop.f32.mrf.mxu1 }
 0x107   :  { %v87_v27 = vmul.f32 %v84_v26, %v24_v21 }
 0x109   :  { %132 = vmatmul.msk.f32.vlgmr.msra.gmra.mxu2 %vm63_vm1, %v87_v27 }
 0x18c   :  { %v121_v29 = vpop.f32.mrf.mxu2 }
 0x18d   :  { %v122_v30 = vadd.f32 %v133_v28, %v121_v29 }
 0x18f   :  { %v124_v31 = vmax.f32 %v122_v30, 0.0 }
 0x191   :  { %125 = vst.msk [vmem:[%s255_s6] sm:$0xff] %vm29_vm0, %v124_v31 }

</bundles_post_ra>
